<compile_context>
chip_gen: v7x
topology: tpu7x:2x2x1
jax: 0.10.0
libtpu: 0.0.40
codegen_flags: <defaults>
</compile_context>

<pallas_src>
import functools

import jax
import jax.numpy as jnp
from jax import lax
from jax.experimental import pallas as pl
from jax.experimental.pallas import tpu as pltpu


def _attn_core_kernel(qi_ref, ki_ref, qn_ref, kn_ref, v_ref, o_ref, acc_ref,
                      *, num_heads):
    """One (batch, triangular (qi,ki) pair) step of causal cosine/ReLU attention.

    qi_ref/ki_ref : SMEM (n_pairs,) int32 -- q-tile / kv-tile index per pair
    qn_ref        : (Tq, D) bf16  per-head L2-normalized Q tile
    kn_ref        : (Tk, D) bf16  per-head L2-normalized K tile
    v_ref         : (Tk, D) bf16  V tile
    o_ref         : (Tq, D) f32   concat-head context output tile
    acc_ref       : (Tq, D) f32   scratch accumulator (resident across ki)
    """
    p = pl.program_id(1)
    qi = qi_ref[p]
    ki = ki_ref[p]
    tq, dim = acc_ref.shape
    dh = dim // num_heads

    @pl.when(ki == 0)
    def _init():
        acc_ref[...] = jnp.zeros_like(acc_ref)

    def _accumulate(masked):
        qn = qn_ref[...]                     # (Tq, D) bf16
        kn = kn_ref[...]                     # (Tk, D) bf16
        v = v_ref[...]                       # (Tk, D) bf16
        tk = kn.shape[0]
        if masked:
            # Tile-local iota is valid only on the diagonal tile (qi == ki),
            # where local row/col offsets equal the global ones.
            row = lax.broadcasted_iota(jnp.int32, (tq, tk), 0)
            col = lax.broadcasted_iota(jnp.int32, (tq, tk), 1)
            keep = col <= row
        for h in range(num_heads):
            sl = slice(h * dh, (h + 1) * dh)
            # Cosine similarities: contract the head dims directly (no K^T).
            s = lax.dot_general(qn[:, sl], kn[:, sl],
                                (((1,), (1,)), ((), ())),
                                preferred_element_type=jnp.float32)  # (Tq, Tk)
            pm = jnp.maximum(s, 0.0)          # ReLU activation, fp32 on VPU
            if masked:
                pm = jnp.where(keep, pm, 0.0)
            # bf16 operands, fp32 accumulation; slice-accumulate per head.
            acc_ref[:, sl] += jnp.dot(pm.astype(jnp.bfloat16), v[:, sl],
                                      preferred_element_type=jnp.float32)

    @pl.when(ki != qi)       # strictly below the diagonal: no mask needed
    def _off_diag():
        _accumulate(masked=False)

    # The diagonal tile is the LAST pair of each qi group in the triangular
    # schedule; it applies the causal mask and emits the finished context.
    # Correctness of this finalize relies on the output block staying resident
    # across consecutive pairs with the same qi (pair axis is 'arbitrary' and
    # innermost) -- do not reorder the grid.
    @pl.when(ki == qi)
    def _diag_and_finalize():
        _accumulate(masked=True)
        o_ref[...] = acc_ref[...].astype(o_ref.dtype)


def attention_forward(x, wq, wk, wv, wo, num_heads, cond=None, block_q=512):
    """Pallas equivalent of Attention.forward (cosine / relu / masks=None).

    x           : (B, S, D) float32
    wq/wk/wv/wo : (D, D) PyTorch-style Linear weights (y = x @ W.T, no bias)
    cond        : optional (B, S, D) conditioning input for Q/K projections
    """
    # TODO(synk): masks != None (padding-mask path), 'l2'/'learnable_norm'
    # distances and 'none'/'gelu'/'sigmoid' activations are not implemented.
    B, S, D = x.shape
    H = num_heads
    assert D % H == 0, "dim must be divisible by num_heads"
    T = min(block_q, S)
    assert S % T == 0, "sequence length must be divisible by the tile size"
    nt = S // T
    dh = D // H

    hp = lax.Precision.HIGHEST
    qk_in = cond if cond is not None else x

    # ---- Hoisted projections + per-head L2 normalization (plain XLA).
    # Computed once per token instead of once per (q_tile, kv_tile) step, and
    # no (D, D) weight slabs ever enter VMEM.
    q = jnp.dot(qk_in, wq.T, precision=hp)
    k = jnp.dot(qk_in, wk.T, precision=hp)
    v = jnp.dot(x, wv.T, precision=hp)

    def headnorm(t):  # per-head L2 normalization, concat-head layout kept
        th = t.reshape(B, S, H, dh)
        th = th / jnp.linalg.norm(th, axis=-1, keepdims=True)
        return th.reshape(B, S, D)

    # bf16 MXU operands (fp32 accumulation happens inside the kernel).
    qn = headnorm(q).astype(jnp.bfloat16)
    kn = headnorm(k).astype(jnp.bfloat16)
    v = v.astype(jnp.bfloat16)

    # ---- Triangular (qi, ki) schedule: only causal tiles are enumerated.
    pairs = [(qi, ki) for qi in range(nt) for ki in range(qi + 1)]
    qi_idx = jnp.asarray([pq for pq, _ in pairs], dtype=jnp.int32)
    ki_idx = jnp.asarray([pk for _, pk in pairs], dtype=jnp.int32)
    n_pairs = len(pairs)

    q_spec = pl.BlockSpec((None, T, D), lambda b, p, qi, ki: (b, qi[p], 0))
    kv_spec = pl.BlockSpec((None, T, D), lambda b, p, qi, ki: (b, ki[p], 0))
    out_spec = pl.BlockSpec((None, T, D), lambda b, p, qi, ki: (b, qi[p], 0))

    # VMEM: 3 bf16 input tiles (double-buffered) + fp32 out tile (x2) + acc.
    blk_bf16 = T * D * 2
    blk_f32 = T * D * 4
    need = 3 * 2 * blk_bf16 + 2 * blk_f32 + blk_f32
    try:
        vmem_cap = pltpu.get_tpu_info().vmem_capacity_bytes
    except Exception:
        vmem_cap = 64 * 1024 * 1024   # conservative (v7x per-core size)
    vmem_limit = int(min(max(2 * need, 8 * 1024 * 1024), (3 * vmem_cap) // 4))

    kernel = functools.partial(_attn_core_kernel, num_heads=H)

    ctx = pl.pallas_call(
        kernel,
        # fp32 context keeps the fp32 accumulator precision for out_proj;
        # switch to bf16 if downstream consumers allow (halves HBM writeback).
        out_shape=jax.ShapeDtypeStruct((B, S, D), jnp.float32),
        grid_spec=pltpu.PrefetchScalarGridSpec(
            num_scalar_prefetch=2,
            grid=(B, n_pairs),
            in_specs=[q_spec, kv_spec, kv_spec],
            out_specs=out_spec,
            scratch_shapes=[pltpu.VMEM((T, D), jnp.float32)],  # concat-head acc
        ),
        compiler_params=pltpu.CompilerParams(
            # Batch axis stays 'parallel' so both v7x TensorCores get work;
            # the fused triangular pair axis must stay 'arbitrary'.  (If B==1,
            # prefer splitting qi back out as a separate parallel axis.)
            dimension_semantics=("parallel", "arbitrary"),
            vmem_limit_bytes=vmem_limit),
    )(qi_idx, ki_idx, qn, kn, v)

    # Output projection hoisted out of the kernel (frees weight VMEM on v7x).
    return jnp.dot(ctx, wo.T, precision=hp)


def reference_forward(x, wq, wk, wv, wo, num_heads):
    """Pure-JAX mirror of the PyTorch forward (default path), for checking."""
    B, S, D = x.shape
    H = num_heads
    d = D // H
    hp = lax.Precision.HIGHEST

    def split(t):
        return t.reshape(B, S, H, d).transpose(0, 2, 1, 3)

    q = split(jnp.dot(x, wq.T, precision=hp))
    k = split(jnp.dot(x, wk.T, precision=hp))
    v = split(jnp.dot(x, wv.T, precision=hp))
    q_n = q / jnp.linalg.norm(q, axis=-1, keepdims=True)
    k_n = k / jnp.linalg.norm(k, axis=-1, keepdims=True)
    scores = jnp.einsum('bhsd,bhtd->bhst', q_n, k_n, precision=hp)
    keep = ~jnp.triu(jnp.ones((S, S), dtype=bool), k=1)
    attn = jax.nn.relu(scores * keep)
    out = jnp.einsum('bhst,bhtd->bhsd', attn, v, precision=hp)
    out = out.transpose(0, 2, 1, 3).reshape(B, S, D)
    return jnp.dot(out, wo.T, precision=hp)


if __name__ == "__main__":
    def make_inputs(B, S, D, key):
        k_x, k_q, k_k, k_v, k_o = jax.random.split(key, 5)
        bound = 1.0 / (D ** 0.5)   # PyTorch nn.Linear default init range
        x = jax.random.normal(k_x, (B, S, D), dtype=jnp.float32)
        ws = [jax.random.uniform(kk, (D, D), jnp.float32, -bound, bound)
              for kk in (k_q, k_k, k_v, k_o)]
        return (x, *ws)

    key = jax.random.PRNGKey(0)
    k1, k2 = jax.random.split(key)

    # bf16 kernel operands (fp32 accumulation) vs fp32 reference: allow a
    # slightly looser tolerance than pure-fp32 math.
    ATOL, RTOL = 3e-2, 2e-2

    # Case 1: module-default small shapes (single tile, single (0,0) pair).
    B, S, D, H = 2, 8, 32, 4
    x, wq, wk, wv, wo = make_inputs(B, S, D, k1)
    out = jax.block_until_ready(attention_forward(x, wq, wk, wv, wo, H))
    ref = jax.block_until_ready(reference_forward(x, wq, wk, wv, wo, H))
    assert out.shape == (B, S, D)
    assert jnp.allclose(out, ref, atol=ATOL, rtol=RTOL), (
        f"max abs diff {jnp.max(jnp.abs(out - ref))}")

    # Case 2: multi-tile — exercises the triangular (qi, ki) schedule, the
    # resident accumulator across the pair axis and the diagonal-only mask.
    B2, S2, D2, H2 = 2, 32, 32, 4
    x2, wq2, wk2, wv2, wo2 = make_inputs(B2, S2, D2, k2)
    out2 = jax.block_until_ready(
        attention_forward(x2, wq2, wk2, wv2, wo2, H2, block_q=8))
    ref2 = jax.block_until_ready(reference_forward(x2, wq2, wk2, wv2, wo2, H2))
    assert out2.shape == (B2, S2, D2)
    assert jnp.allclose(out2, ref2, atol=ATOL, rtol=RTOL), (
        f"max abs diff {jnp.max(jnp.abs(out2 - ref2))}")

    print("KERNEL_OK")
</pallas_src>

<mosaic_0001>
module attributes {stable_mosaic.version = 11 : i64} {
  func.func @_attn_core_kernel(%arg0: i32, %arg1: i32, %arg2: memref<1xi32, #tpu.memory_space<smem>>, %arg3: memref<1xi32, #tpu.memory_space<smem>>, %arg4: memref<1x8x32xbf16, #tpu.memory_space<vmem>>, %arg5: memref<1x8x32xbf16, #tpu.memory_space<vmem>>, %arg6: memref<1x8x32xbf16, #tpu.memory_space<vmem>>, %arg7: memref<1x8x32xf32, #tpu.memory_space<vmem>>, %arg8: memref<8x32xf32, #tpu.memory_space<vmem>>) attributes {dimension_semantics = [#tpu.dimension_semantics<parallel>, #tpu.dimension_semantics<arbitrary>], iteration_bounds = array<i64: 2, 1>, scalar_prefetch = 2 : i64, scratch_operands = 1 : i64, tpu.core_type = #tpu.core_type<tc>, window_params = [{transform_indices = @transform_0, window_bounds = array<i64: 1, 8, 32>}, {transform_indices = @transform_1, window_bounds = array<i64: 1, 8, 32>}, {transform_indices = @transform_2, window_bounds = array<i64: 1, 8, 32>}, {transform_indices = @transform_3, window_bounds = array<i64: 1, 8, 32>}]} {
    %0 = arith.index_cast %arg1 : i32 to index
    %1 = memref.load %arg2[%0] : memref<1xi32, #tpu.memory_space<smem>>
    %2 = arith.index_cast %arg1 : i32 to index
    %3 = memref.load %arg3[%2] : memref<1xi32, #tpu.memory_space<smem>>
    %c0_i32 = arith.constant 0 : i32
    %4 = arith.cmpi eq, %3, %c0_i32 : i32
    %5 = arith.extui %4 : i1 to i32
    %c0_i32_0 = arith.constant 0 : i32
    %6 = arith.cmpi ne, %5, %c0_i32_0 : i32
    scf.if %6 {
      %cst = arith.constant 0.000000e+00 : f32
      %13 = vector.broadcast %cst : f32 to vector<8x32xf32>
      %c0 = arith.constant 0 : index
      %c0_3 = arith.constant 0 : index
      %14 = vector.load %arg8[%c0, %c0_3] : memref<8x32xf32, #tpu.memory_space<vmem>>, vector<8x32xf32>
      tpu.vector_store %arg8[%c0, %c0_3], %13 {strides = array<i32>} : memref<8x32xf32, #tpu.memory_space<vmem>>, vector<8x32xf32>,
    } else {
    }
    %7 = arith.cmpi ne, %3, %1 : i32
    %8 = arith.extui %7 : i1 to i32
    %c0_i32_1 = arith.constant 0 : i32
    %9 = arith.cmpi ne, %8, %c0_i32_1 : i32
    scf.if %9 {
      %c0 = arith.constant 0 : index
      %c0_3 = arith.constant 0 : index
      %c0_4 = arith.constant 0 : index
      %13 = vector.load %arg4[%c0, %c0_3, %c0_4] : memref<1x8x32xbf16, #tpu.memory_space<vmem>>, vector<1x8x32xbf16>
      %14 = vector.shape_cast %13 : vector<1x8x32xbf16> to vector<8x32xbf16>
      %c0_5 = arith.constant 0 : index
      %c0_6 = arith.constant 0 : index
      %c0_7 = arith.constant 0 : index
      %15 = vector.load %arg5[%c0_5, %c0_6, %c0_7] : memref<1x8x32xbf16, #tpu.memory_space<vmem>>, vector<1x8x32xbf16>
      %16 = vector.shape_cast %15 : vector<1x8x32xbf16> to vector<8x32xbf16>
      %c0_8 = arith.constant 0 : index
      %c0_9 = arith.constant 0 : index
      %c0_10 = arith.constant 0 : index
      %17 = vector.load %arg6[%c0_8, %c0_9, %c0_10] : memref<1x8x32xbf16, #tpu.memory_space<vmem>>, vector<1x8x32xbf16>
      %18 = vector.shape_cast %17 : vector<1x8x32xbf16> to vector<8x32xbf16>
      %19 = vector.extract_strided_slice %14 {offsets = [0, 0], sizes = [8, 8], strides = [1, 1]} : vector<8x32xbf16> to vector<8x8xbf16>
      %20 = vector.extract_strided_slice %16 {offsets = [0, 0], sizes = [8, 8], strides = [1, 1]} : vector<8x32xbf16> to vector<8x8xbf16>
      %cst = arith.constant dense<0.000000e+00> : vector<8x8xf32>
      %21 = tpu.matmul %19, %20, %cst {dimension_numbers = #tpu.dot_dimension_numbers<[1], [1], [0], [0], [0, 0, 1, 0], [], []>} : vector<8x8xbf16>, vector<8x8xbf16>, vector<8x8xf32> -> vector<8x8xf32>
      %cst_11 = arith.constant 0.000000e+00 : f32
      %22 = vector.broadcast %cst_11 : f32 to vector<8x8xf32>
      %23 = arith.maximumf %21, %22 : vector<8x8xf32>
      %c0_12 = arith.constant 0 : index
      %c0_13 = arith.constant 0 : index
      %24 = vector.load %arg8[%c0_12, %c0_13] : memref<8x32xf32, #tpu.memory_space<vmem>>, vector<8x8xf32>
      %25 = arith.truncf %23 : vector<8x8xf32> to vector<8x8xbf16>
      %26 = vector.extract_strided_slice %18 {offsets = [0, 0], sizes = [8, 8], strides = [1, 1]} : vector<8x32xbf16> to vector<8x8xbf16>
      %cst_14 = arith.constant dense<0.000000e+00> : vector<8x8xf32>
      %27 = tpu.matmul %25, %26, %cst_14 {dimension_numbers = #tpu.dot_dimension_numbers<[1], [0], [0], [1], [0, 0, 1, 1], [], []>} : vector<8x8xbf16>, vector<8x8xbf16>, vector<8x8xf32> -> vector<8x8xf32>
      %28 = arith.addf %24, %27 : vector<8x8xf32>
      %c0_15 = arith.constant 0 : index
      %c0_16 = arith.constant 0 : index
      %29 = vector.load %arg8[%c0_15, %c0_16] : memref<8x32xf32, #tpu.memory_space<vmem>>, vector<8x8xf32>
      tpu.vector_store %arg8[%c0_15, %c0_16], %28 {strides = array<i32>} : memref<8x32xf32, #tpu.memory_space<vmem>>, vector<8x8xf32>,
      %30 = vector.extract_strided_slice %14 {offsets = [0, 8], sizes = [8, 8], strides = [1, 1]} : vector<8x32xbf16> to vector<8x8xbf16>
      %31 = vector.extract_strided_slice %16 {offsets = [0, 8], sizes = [8, 8], strides = [1, 1]} : vector<8x32xbf16> to vector<8x8xbf16>
      %cst_17 = arith.constant dense<0.000000e+00> : vector<8x8xf32>
      %32 = tpu.matmul %30, %31, %cst_17 {dimension_numbers = #tpu.dot_dimension_numbers<[1], [1], [0], [0], [0, 0, 1, 0], [], []>} : vector<8x8xbf16>, vector<8x8xbf16>, vector<8x8xf32> -> vector<8x8xf32>
      %cst_18 = arith.constant 0.000000e+00 : f32
      %33 = vector.broadcast %cst_18 : f32 to vector<8x8xf32>
      %34 = arith.maximumf %32, %33 : vector<8x8xf32>
      %c0_19 = arith.constant 0 : index
      %c8 = arith.constant 8 : index
      %35 = vector.load %arg8[%c0_19, %c8] : memref<8x32xf32, #tpu.memory_space<vmem>>, vector<8x8xf32>
      %36 = arith.truncf %34 : vector<8x8xf32> to vector<8x8xbf16>
      %37 = vector.extract_strided_slice %18 {offsets = [0, 8], sizes = [8, 8], strides = [1, 1]} : vector<8x32xbf16> to vector<8x8xbf16>
      %cst_20 = arith.constant dense<0.000000e+00> : vector<8x8xf32>
      %38 = tpu.matmul %36, %37, %cst_20 {dimension_numbers = #tpu.dot_dimension_numbers<[1], [0], [0], [1], [0, 0, 1, 1], [], []>} : vector<8x8xbf16>, vector<8x8xbf16>, vector<8x8xf32> -> vector<8x8xf32>
      %39 = arith.addf %35, %38 : vector<8x8xf32>
      %c0_21 = arith.constant 0 : index
      %c8_22 = arith.constant 8 : index
      %40 = vector.load %arg8[%c0_21, %c8_22] : memref<8x32xf32, #tpu.memory_space<vmem>>, vector<8x8xf32>
      tpu.vector_store %arg8[%c0_21, %c8_22], %39 {strides = array<i32>} : memref<8x32xf32, #tpu.memory_space<vmem>>, vector<8x8xf32>,
      %41 = vector.extract_strided_slice %14 {offsets = [0, 16], sizes = [8, 8], strides = [1, 1]} : vector<8x32xbf16> to vector<8x8xbf16>
      %42 = vector.extract_strided_slice %16 {offsets = [0, 16], sizes = [8, 8], strides = [1, 1]} : vector<8x32xbf16> to vector<8x8xbf16>
      %cst_23 = arith.constant dense<0.000000e+00> : vector<8x8xf32>
      %43 = tpu.matmul %41, %42, %cst_23 {dimension_numbers = #tpu.dot_dimension_numbers<[1], [1], [0], [0], [0, 0, 1, 0], [], []>} : vector<8x8xbf16>, vector<8x8xbf16>, vector<8x8xf32> -> vector<8x8xf32>
      %cst_24 = arith.constant 0.000000e+00 : f32
      %44 = vector.broadcast %cst_24 : f32 to vector<8x8xf32>
      %45 = arith.maximumf %43, %44 : vector<8x8xf32>
      %c0_25 = arith.constant 0 : index
      %c16 = arith.constant 16 : index
      %46 = vector.load %arg8[%c0_25, %c16] : memref<8x32xf32, #tpu.memory_space<vmem>>, vector<8x8xf32>
      %47 = arith.truncf %45 : vector<8x8xf32> to vector<8x8xbf16>
      %48 = vector.extract_strided_slice %18 {offsets = [0, 16], sizes = [8, 8], strides = [1, 1]} : vector<8x32xbf16> to vector<8x8xbf16>
      %cst_26 = arith.constant dense<0.000000e+00> : vector<8x8xf32>
      %49 = tpu.matmul %47, %48, %cst_26 {dimension_numbers = #tpu.dot_dimension_numbers<[1], [0], [0], [1], [0, 0, 1, 1], [], []>} : vector<8x8xbf16>, vector<8x8xbf16>, vector<8x8xf32> -> vector<8x8xf32>
      %50 = arith.addf %46, %49 : vector<8x8xf32>
      %c0_27 = arith.constant 0 : index
      %c16_28 = arith.constant 16 : index
      %51 = vector.load %arg8[%c0_27, %c16_28] : memref<8x32xf32, #tpu.memory_space<vmem>>, vector<8x8xf32>
      tpu.vector_store %arg8[%c0_27, %c16_28], %50 {strides = array<i32>} : memref<8x32xf32, #tpu.memory_space<vmem>>, vector<8x8xf32>,
      %52 = vector.extract_strided_slice %14 {offsets = [0, 24], sizes = [8, 8], strides = [1, 1]} : vector<8x32xbf16> to vector<8x8xbf16>
      %53 = vector.extract_strided_slice %16 {offsets = [0, 24], sizes = [8, 8], strides = [1, 1]} : vector<8x32xbf16> to vector<8x8xbf16>
      %cst_29 = arith.constant dense<0.000000e+00> : vector<8x8xf32>
      %54 = tpu.matmul %52, %53, %cst_29 {dimension_numbers = #tpu.dot_dimension_numbers<[1], [1], [0], [0], [0, 0, 1, 0], [], []>} : vector<8x8xbf16>, vector<8x8xbf16>, vector<8x8xf32> -> vector<8x8xf32>
      %cst_30 = arith.constant 0.000000e+00 : f32
      %55 = vector.broadcast %cst_30 : f32 to vector<8x8xf32>
      %56 = arith.maximumf %54, %55 : vector<8x8xf32>
      %c0_31 = arith.constant 0 : index
      %c24 = arith.constant 24 : index
      %57 = vector.load %arg8[%c0_31, %c24] : memref<8x32xf32, #tpu.memory_space<vmem>>, vector<8x8xf32>
      %58 = arith.truncf %56 : vector<8x8xf32> to vector<8x8xbf16>
      %59 = vector.extract_strided_slice %18 {offsets = [0, 24], sizes = [8, 8], strides = [1, 1]} : vector<8x32xbf16> to vector<8x8xbf16>
      %cst_32 = arith.constant dense<0.000000e+00> : vector<8x8xf32>
      %60 = tpu.matmul %58, %59, %cst_32 {dimension_numbers = #tpu.dot_dimension_numbers<[1], [0], [0], [1], [0, 0, 1, 1], [], []>} : vector<8x8xbf16>, vector<8x8xbf16>, vector<8x8xf32> -> vector<8x8xf32>
      %61 = arith.addf %57, %60 : vector<8x8xf32>
      %c0_33 = arith.constant 0 : index
      %c24_34 = arith.constant 24 : index
      %62 = vector.load %arg8[%c0_33, %c24_34] : memref<8x32xf32, #tpu.memory_space<vmem>>, vector<8x8xf32>
      tpu.vector_store %arg8[%c0_33, %c24_34], %61 {strides = array<i32>} : memref<8x32xf32, #tpu.memory_space<vmem>>, vector<8x8xf32>,
    } else {
    }
    %10 = arith.cmpi eq, %3, %1 : i32
    %11 = arith.extui %10 : i1 to i32
    %c0_i32_2 = arith.constant 0 : i32
    %12 = arith.cmpi ne, %11, %c0_i32_2 : i32
    scf.if %12 {
      %c0 = arith.constant 0 : index
      %c0_3 = arith.constant 0 : index
      %c0_4 = arith.constant 0 : index
      %13 = vector.load %arg4[%c0, %c0_3, %c0_4] : memref<1x8x32xbf16, #tpu.memory_space<vmem>>, vector<1x8x32xbf16>
      %14 = vector.shape_cast %13 : vector<1x8x32xbf16> to vector<8x32xbf16>
      %c0_5 = arith.constant 0 : index
      %c0_6 = arith.constant 0 : index
      %c0_7 = arith.constant 0 : index
      %15 = vector.load %arg5[%c0_5, %c0_6, %c0_7] : memref<1x8x32xbf16, #tpu.memory_space<vmem>>, vector<1x8x32xbf16>
      %16 = vector.shape_cast %15 : vector<1x8x32xbf16> to vector<8x32xbf16>
      %c0_8 = arith.constant 0 : index
      %c0_9 = arith.constant 0 : index
      %c0_10 = arith.constant 0 : index
      %17 = vector.load %arg6[%c0_8, %c0_9, %c0_10] : memref<1x8x32xbf16, #tpu.memory_space<vmem>>, vector<1x8x32xbf16>
      %18 = vector.shape_cast %17 : vector<1x8x32xbf16> to vector<8x32xbf16>
      %19 = tpu.iota {dimensions = array<i32: 0>} : vector<8x8xi32>
      %20 = tpu.iota {dimensions = array<i32: 1>} : vector<8x8xi32>
      %21 = arith.cmpi sle, %20, %19 : vector<8x8xi32>
      %22 = vector.extract_strided_slice %14 {offsets = [0, 0], sizes = [8, 8], strides = [1, 1]} : vector<8x32xbf16> to vector<8x8xbf16>
      %23 = vector.extract_strided_slice %16 {offsets = [0, 0], sizes = [8, 8], strides = [1, 1]} : vector<8x32xbf16> to vector<8x8xbf16>
      %cst = arith.constant dense<0.000000e+00> : vector<8x8xf32>
      %24 = tpu.matmul %22, %23, %cst {dimension_numbers = #tpu.dot_dimension_numbers<[1], [1], [0], [0], [0, 0, 1, 0], [], []>} : vector<8x8xbf16>, vector<8x8xbf16>, vector<8x8xf32> -> vector<8x8xf32>
      %cst_11 = arith.constant 0.000000e+00 : f32
      %25 = vector.broadcast %cst_11 : f32 to vector<8x8xf32>
      %26 = arith.maximumf %24, %25 : vector<8x8xf32>
      %cst_12 = arith.constant 0.000000e+00 : f32
      %27 = vector.broadcast %cst_12 : f32 to vector<8x8xf32>
      %28 = arith.select %21, %26, %27 : vector<8x8xi1>, vector<8x8xf32>
      %c0_13 = arith.constant 0 : index
      %c0_14 = arith.constant 0 : index
      %29 = vector.load %arg8[%c0_13, %c0_14] : memref<8x32xf32, #tpu.memory_space<vmem>>, vector<8x8xf32>
      %30 = arith.truncf %28 : vector<8x8xf32> to vector<8x8xbf16>
      %31 = vector.extract_strided_slice %18 {offsets = [0, 0], sizes = [8, 8], strides = [1, 1]} : vector<8x32xbf16> to vector<8x8xbf16>
      %cst_15 = arith.constant dense<0.000000e+00> : vector<8x8xf32>
      %32 = tpu.matmul %30, %31, %cst_15 {dimension_numbers = #tpu.dot_dimension_numbers<[1], [0], [0], [1], [0, 0, 1, 1], [], []>} : vector<8x8xbf16>, vector<8x8xbf16>, vector<8x8xf32> -> vector<8x8xf32>
      %33 = arith.addf %29, %32 : vector<8x8xf32>
      %c0_16 = arith.constant 0 : index
      %c0_17 = arith.constant 0 : index
      %34 = vector.load %arg8[%c0_16, %c0_17] : memref<8x32xf32, #tpu.memory_space<vmem>>, vector<8x8xf32>
      tpu.vector_store %arg8[%c0_16, %c0_17], %33 {strides = array<i32>} : memref<8x32xf32, #tpu.memory_space<vmem>>, vector<8x8xf32>,
      %35 = vector.extract_strided_slice %14 {offsets = [0, 8], sizes = [8, 8], strides = [1, 1]} : vector<8x32xbf16> to vector<8x8xbf16>
      %36 = vector.extract_strided_slice %16 {offsets = [0, 8], sizes = [8, 8], strides = [1, 1]} : vector<8x32xbf16> to vector<8x8xbf16>
      %cst_18 = arith.constant dense<0.000000e+00> : vector<8x8xf32>
      %37 = tpu.matmul %35, %36, %cst_18 {dimension_numbers = #tpu.dot_dimension_numbers<[1], [1], [0], [0], [0, 0, 1, 0], [], []>} : vector<8x8xbf16>, vector<8x8xbf16>, vector<8x8xf32> -> vector<8x8xf32>
      %cst_19 = arith.constant 0.000000e+00 : f32
      %38 = vector.broadcast %cst_19 : f32 to vector<8x8xf32>
      %39 = arith.maximumf %37, %38 : vector<8x8xf32>
      %cst_20 = arith.constant 0.000000e+00 : f32
      %40 = vector.broadcast %cst_20 : f32 to vector<8x8xf32>
      %41 = arith.select %21, %39, %40 : vector<8x8xi1>, vector<8x8xf32>
      %c0_21 = arith.constant 0 : index
      %c8 = arith.constant 8 : index
      %42 = vector.load %arg8[%c0_21, %c8] : memref<8x32xf32, #tpu.memory_space<vmem>>, vector<8x8xf32>
      %43 = arith.truncf %41 : vector<8x8xf32> to vector<8x8xbf16>
      %44 = vector.extract_strided_slice %18 {offsets = [0, 8], sizes = [8, 8], strides = [1, 1]} : vector<8x32xbf16> to vector<8x8xbf16>
      %cst_22 = arith.constant dense<0.000000e+00> : vector<8x8xf32>
      %45 = tpu.matmul %43, %44, %cst_22 {dimension_numbers = #tpu.dot_dimension_numbers<[1], [0], [0], [1], [0, 0, 1, 1], [], []>} : vector<8x8xbf16>, vector<8x8xbf16>, vector<8x8xf32> -> vector<8x8xf32>
      %46 = arith.addf %42, %45 : vector<8x8xf32>
      %c0_23 = arith.constant 0 : index
      %c8_24 = arith.constant 8 : index
      %47 = vector.load %arg8[%c0_23, %c8_24] : memref<8x32xf32, #tpu.memory_space<vmem>>, vector<8x8xf32>
      tpu.vector_store %arg8[%c0_23, %c8_24], %46 {strides = array<i32>} : memref<8x32xf32, #tpu.memory_space<vmem>>, vector<8x8xf32>,
      %48 = vector.extract_strided_slice %14 {offsets = [0, 16], sizes = [8, 8], strides = [1, 1]} : vector<8x32xbf16> to vector<8x8xbf16>
      %49 = vector.extract_strided_slice %16 {offsets = [0, 16], sizes = [8, 8], strides = [1, 1]} : vector<8x32xbf16> to vector<8x8xbf16>
      %cst_25 = arith.constant dense<0.000000e+00> : vector<8x8xf32>
      %50 = tpu.matmul %48, %49, %cst_25 {dimension_numbers = #tpu.dot_dimension_numbers<[1], [1], [0], [0], [0, 0, 1, 0], [], []>} : vector<8x8xbf16>, vector<8x8xbf16>, vector<8x8xf32> -> vector<8x8xf32>
      %cst_26 = arith.constant 0.000000e+00 : f32
      %51 = vector.broadcast %cst_26 : f32 to vector<8x8xf32>
      %52 = arith.maximumf %50, %51 : vector<8x8xf32>
      %cst_27 = arith.constant 0.000000e+00 : f32
      %53 = vector.broadcast %cst_27 : f32 to vector<8x8xf32>
      %54 = arith.select %21, %52, %53 : vector<8x8xi1>, vector<8x8xf32>
      %c0_28 = arith.constant 0 : index
      %c16 = arith.constant 16 : index
      %55 = vector.load %arg8[%c0_28, %c16] : memref<8x32xf32, #tpu.memory_space<vmem>>, vector<8x8xf32>
      %56 = arith.truncf %54 : vector<8x8xf32> to vector<8x8xbf16>
      %57 = vector.extract_strided_slice %18 {offsets = [0, 16], sizes = [8, 8], strides = [1, 1]} : vector<8x32xbf16> to vector<8x8xbf16>
      %cst_29 = arith.constant dense<0.000000e+00> : vector<8x8xf32>
      %58 = tpu.matmul %56, %57, %cst_29 {dimension_numbers = #tpu.dot_dimension_numbers<[1], [0], [0], [1], [0, 0, 1, 1], [], []>} : vector<8x8xbf16>, vector<8x8xbf16>, vector<8x8xf32> -> vector<8x8xf32>
      %59 = arith.addf %55, %58 : vector<8x8xf32>
      %c0_30 = arith.constant 0 : index
      %c16_31 = arith.constant 16 : index
      %60 = vector.load %arg8[%c0_30, %c16_31] : memref<8x32xf32, #tpu.memory_space<vmem>>, vector<8x8xf32>
      tpu.vector_store %arg8[%c0_30, %c16_31], %59 {strides = array<i32>} : memref<8x32xf32, #tpu.memory_space<vmem>>, vector<8x8xf32>,
      %61 = vector.extract_strided_slice %14 {offsets = [0, 24], sizes = [8, 8], strides = [1, 1]} : vector<8x32xbf16> to vector<8x8xbf16>
      %62 = vector.extract_strided_slice %16 {offsets = [0, 24], sizes = [8, 8], strides = [1, 1]} : vector<8x32xbf16> to vector<8x8xbf16>
      %cst_32 = arith.constant dense<0.000000e+00> : vector<8x8xf32>
      %63 = tpu.matmul %61, %62, %cst_32 {dimension_numbers = #tpu.dot_dimension_numbers<[1], [1], [0], [0], [0, 0, 1, 0], [], []>} : vector<8x8xbf16>, vector<8x8xbf16>, vector<8x8xf32> -> vector<8x8xf32>
      %cst_33 = arith.constant 0.000000e+00 : f32
      %64 = vector.broadcast %cst_33 : f32 to vector<8x8xf32>
      %65 = arith.maximumf %63, %64 : vector<8x8xf32>
      %cst_34 = arith.constant 0.000000e+00 : f32
      %66 = vector.broadcast %cst_34 : f32 to vector<8x8xf32>
      %67 = arith.select %21, %65, %66 : vector<8x8xi1>, vector<8x8xf32>
      %c0_35 = arith.constant 0 : index
      %c24 = arith.constant 24 : index
      %68 = vector.load %arg8[%c0_35, %c24] : memref<8x32xf32, #tpu.memory_space<vmem>>, vector<8x8xf32>
      %69 = arith.truncf %67 : vector<8x8xf32> to vector<8x8xbf16>
      %70 = vector.extract_strided_slice %18 {offsets = [0, 24], sizes = [8, 8], strides = [1, 1]} : vector<8x32xbf16> to vector<8x8xbf16>
      %cst_36 = arith.constant dense<0.000000e+00> : vector<8x8xf32>
      %71 = tpu.matmul %69, %70, %cst_36 {dimension_numbers = #tpu.dot_dimension_numbers<[1], [0], [0], [1], [0, 0, 1, 1], [], []>} : vector<8x8xbf16>, vector<8x8xbf16>, vector<8x8xf32> -> vector<8x8xf32>
      %72 = arith.addf %68, %71 : vector<8x8xf32>
      %c0_37 = arith.constant 0 : index
      %c24_38 = arith.constant 24 : index
      %73 = vector.load %arg8[%c0_37, %c24_38] : memref<8x32xf32, #tpu.memory_space<vmem>>, vector<8x8xf32>
      tpu.vector_store %arg8[%c0_37, %c24_38], %72 {strides = array<i32>} : memref<8x32xf32, #tpu.memory_space<vmem>>, vector<8x8xf32>,
      %c0_39 = arith.constant 0 : index
      %c0_40 = arith.constant 0 : index
      %74 = vector.load %arg8[%c0_39, %c0_40] : memref<8x32xf32, #tpu.memory_space<vmem>>, vector<8x32xf32>
      %c0_41 = arith.constant 0 : index
      %c0_42 = arith.constant 0 : index
      %c0_43 = arith.constant 0 : index
      %75 = vector.load %arg7[%c0_41, %c0_42, %c0_43] : memref<1x8x32xf32, #tpu.memory_space<vmem>>, vector<1x8x32xf32>
      %76 = vector.shape_cast %75 : vector<1x8x32xf32> to vector<8x32xf32>
      %77 = vector.shape_cast %74 : vector<8x32xf32> to vector<1x8x32xf32>
      tpu.vector_store %arg7[%c0_41, %c0_42, %c0_43], %77 {strides = array<i32>} : memref<1x8x32xf32, #tpu.memory_space<vmem>>, vector<1x8x32xf32>,
    } else {
    }
    return
  }
  func.func @transform_0(%arg0: i32, %arg1: i32, %arg2: memref<1xi32, #tpu.memory_space<smem>>, %arg3: memref<1xi32, #tpu.memory_space<smem>>) -> (i32, i32, i32) {
    %0 = arith.index_cast %arg1 : i32 to index
    %1 = memref.load %arg2[%0] : memref<1xi32, #tpu.memory_space<smem>>
    %c0_i32 = arith.constant 0 : i32
    %c0_i32_0 = arith.constant 0 : i32
    return %arg0, %1, %c0_i32 : i32, i32, i32
  }
  func.func @transform_1(%arg0: i32, %arg1: i32, %arg2: memref<1xi32, #tpu.memory_space<smem>>, %arg3: memref<1xi32, #tpu.memory_space<smem>>) -> (i32, i32, i32) {
    %0 = arith.index_cast %arg1 : i32 to index
    %1 = memref.load %arg3[%0] : memref<1xi32, #tpu.memory_space<smem>>
    %c0_i32 = arith.constant 0 : i32
    %c0_i32_0 = arith.constant 0 : i32
    return %arg0, %1, %c0_i32 : i32, i32, i32
  }
  func.func @transform_2(%arg0: i32, %arg1: i32, %arg2: memref<1xi32, #tpu.memory_space<smem>>, %arg3: memref<1xi32, #tpu.memory_space<smem>>) -> (i32, i32, i32) {
    %0 = arith.index_cast %arg1 : i32 to index
    %1 = memref.load %arg3[%0] : memref<1xi32, #tpu.memory_space<smem>>
    %c0_i32 = arith.constant 0 : i32
    %c0_i32_0 = arith.constant 0 : i32
    return %arg0, %1, %c0_i32 : i32, i32, i32
  }
  func.func @transform_3(%arg0: i32, %arg1: i32, %arg2: memref<1xi32, #tpu.memory_space<smem>>, %arg3: memref<1xi32, #tpu.memory_space<smem>>) -> (i32, i32, i32) {
    %0 = arith.index_cast %arg1 : i32 to index
    %1 = memref.load %arg2[%0] : memref<1xi32, #tpu.memory_space<smem>>
    %c0_i32 = arith.constant 0 : i32
    %c0_i32_0 = arith.constant 0 : i32
    return %arg0, %1, %c0_i32 : i32, i32, i32
  }
}

</mosaic_0001>

<bundles_post_ra>
// kernel: tpu_custom_call.1
= control target key start
LH: loop header
LB: loop body
LE: loop exit
PB: predicated region body
PF: predicated region fallthrough
CT: control target
= control target key end

     0   :  { %s2336_s0 = inlined_call_operand.<no memory space> [shape: s32[1], index: 0, kind: input, shape index: {}]   ;;  %s2337_s1 = inlined_call_operand.<no memory space> [shape: s32[1], index: 1, kind: input, shape index: {}]   ;;  %s2338_s2 = inlined_call_operand.hbm [shape: bf16[2,8,32], index: 2, kind: input, shape index: {}]   ;;  %s2339_s3 = inlined_call_operand.vmem [shape: bf16[2,8,32], index: 3, kind: input, shape index: {}]   ;;  %s2340_s4 = inlined_call_operand.hbm [shape: bf16[2,8,32], index: 4, kind: input, shape index: {}]   ;;  %s2341_s5 = inlined_call_operand.hbm [shape: f32[2,8,32], index: 5, kind: output, shape index: {}]  }
   0x1   :  { %2351 = sst [smem:[#allocation19_spill]] %s2341_s5 }
   0x2   :  { %10 = sst [smem:[#allocation4]] %s2336_s0 }
   0x3   :  { %11 = sst [smem:[#allocation5]] %s2337_s1 }
   0x4   :  { %12 = vsyncpa [#allocation7], 0 }
   0x5   :  { %14 = vsyncpa [#allocation7 + $0x1], 0 }
   0x6   :  { %15 = vsyncpa [#allocation10], 0 }
   0x7   :  { %17 = vsyncpa [#allocation10 + $0x1], 0 }
   0x8   :  { %18 = vsyncpa [#allocation8], 0 }
   0x9   :  { %20 = vsyncpa [#allocation8 + $0x1], 0  ;;  %s1887_s22 = smov 0   ;;  %s1889_s23 = smov 0  }
   0xa   :  { %s1891_s24 = smov 0   ;;  %s1893_s25 = smov 0  }
   0xb   :  { %s1895_s26 = smov 0   ;;  %s1897_s0 = smov 0  }
   0xc   :  { %s1899_s27 = smov 0   ;;  %s1901_s1 = smov 0  }
   0xd   :  { %s1903_s28 = smov 0   ;;  %s1905_s29 = smov 0  }
   0xe   :  { %s1907_s30 = smov 0   ;;  %s1909_s6 = smov 0  }
   0xf LB: > { %2352 = sst [smem:[#allocation15_spill]] %s1793_s24  ;;  %s1327_s7 = sadd.s32 4294967295, %s1829_s6   ;;  %s1829_s6 = sphi %s1909_s6, %s26_s6   ;;  %s1825_s30 = sphi %s1907_s30, %s2390_s30   ;;  %s1821_s29 = sphi %s1905_s29, %s2389_s29   ;;  %s1817_s28 = sphi %s1903_s28, %s2388_s28   ;;  %s1813_s1 = sphi %s1901_s1, %s2387_s1   ;;  %s1809_s27 = sphi %s1899_s27, %s2386_s27   ;;  %s1805_s0 = sphi %s1897_s0, %s2385_s0   ;;  %s1801_s26 = sphi %s1895_s26, %s2384_s26   ;;  %s1797_s25 = sphi %s1893_s25, %s2383_s25   ;;  %s1793_s24 = sphi %s1891_s24, %s2378_s24   ;;  %s1789_s23 = sphi %s1889_s23, %s2382_s23   ;;  %s1785_s22 = sphi %s1887_s22, %s2381_s22  }
  0x10   : > { %s1328_s8 = sadd.s32 4294967294, %s1829_s6   ;;  %s38_s9 = sadd.s32 1, %s1825_s30 }
  0x11   : > { %s42_s10 = sld [smem:[#allocation4]]  ;;  %p40_p0 = scmp.ge.s32.totalorder %s38_s9, 2 }
  0x12   : > { %s49_s11 = sadd.s32 1, %s1817_s28  ;;  %p56_p1 = scmp.ne.s32.totalorder %s1817_s28, %s1813_s1 }
  0x13   : > { %p2345_p2 = scmp.eq.s32.totalorder %s1829_s6, 0  ;;  %s2392_s9 = smov (%p40_p0, %s38_s9), 0 }
  0x14   : > { %2353 = sst [smem:[#allocation16_spill]] %s2392_s9  ;;  %p62_p4 = scmp.ne.s32.totalorder %s1813_s1, %s1809_s27 }
  0x15   : > { %p1956_p3 = por %p2345_p2, %p56_p1  ;;  %s44_s13 = ssub.s32 %s1825_s30, %s2392_s9 }
  0x16   : > { %p1963_p5 = scmp.eq.s32.totalorder %s1327_s7, 0  ;;  %s1967_s15 = sld [smem:[#allocation5]] }
  0x17   : > { %p1975_p7 = scmp.eq.s32.totalorder %s44_s13, 0  ;;  %s139_s18 = sadd.s32 1, %s1793_s24 }
  0x18   : > { %s2355_s14 = scalar_select %p1963_p5, 1, 0 }
  0x19   : > { %p1971_p6 = por %p1963_p5, %p62_p4  ;;  %p149_p8 = scmp.ne.s32.totalorder %s1793_s24, %s1789_s23 }
  0x1a   : > { %p150_p9 = scmp.eq.s32.totalorder %s1327_s7, 1  ;;  %p155_p11 = scmp.ne.s32.totalorder %s1789_s23, %s1785_s22 }
  0x1b   : > { %s2356_s16 = scalar_select %p1971_p6, 1, 0 }
  0x1c   : > { %s1985_s19 = scalar_select %p1975_p7, %s1817_s28, %s49_s11  }
  0x1d   : > { %s1990_s20 = scalar_select %p1975_p7, %s1793_s24, %s139_s18  }
  0x1e   : > { %2358 = sst [smem:[#allocation17_spill]] %s1985_s19  ;;  %p1992_p10 = por %p150_p9, %p149_p8 }
  0x1f   : > { %2359 = sst [smem:[#allocation18_spill]] %s1990_s20  ;;  %p156_p12 = scmp.eq.s32.totalorder %s1328_s8, 1 }
  0x20   : > { %s2360_s21 = scalar_select %p1992_p10, 1, 0 }
  0x21   : > { %p2346_p0 = scmp.lt.s32.totalorder %s1829_s6, 2  ;;  %p2000_p1 = por %p156_p12, %p155_p11 }
  0x22   : > { %s176_s7 = sand.u32 1, %s1817_s28   ;;  %s185_s13 = sadd.s32 %s1825_s30, %s42_s10 }
  0x23   : > { %s2361_s27 = scalar_select %p2000_p1, 1, 0 }
  0x24   : > { %s1331_s11 = sshll.u32 %s176_s7, 2  ;;  %s1332_s9 = sshll.u32 %s185_s13, 6 }
  0x25   : > { %s180_s18 = scalar_lea.vmem [#allocation6], %s1331_s11  ;;  %s2009_s5 = scalar_lea.hbm %s2338_s2, %s1332_s9 }
  0x26   : > { %s189_s19 = sshll.u32 %s180_s18, 4  ;;  %p2017_p4 = pnand %p2346_p0, %p1956_p3  ;;  %s2011_s19 = int_to_ptr.vmem [resolvable:$true] %s189_s19 }
  0x27   : > { %s177_s10 = scalar_lea.sflag [#allocation7], %s176_s7  ;;  %s1635_s24 = scalar_lea.hbm %s2009_s5, 64 }
  0x28   : > { %p1636_p11 = scmp.ne.s32.totalorder %s2009_s5, %s1635_s24  ;;  %p1637_p12 = pneg %p2017_p4 }
  0x29   : > { %s1640_s20 = scalar_lea.hbm %s2338_s2, 128  ;;  %p1641_p3 = scmp.lt.u32.totalorder %s2009_s5, %s2338_s2 }
  0x2a   : > { %p1638_p13 = pnand %p1637_p12, %p1636_p11  ;;  %p1642_p0 = scmp.lt.u32.totalorder %s1640_s20, %s1635_s24 }
  0x2b   : > { %p1644_p9 = scmp.lt.u32.totalorder %s1635_s24, %s2009_s5 }
  0x2c   : > { %p1639_p2 = pneg %p1638_p13  ;;  %p1643_p8 = por %p1642_p0, %p1641_p3 }
  0x2e   : > { %p1645_p1 = por %p1644_p9, %p1643_p8 }
  0x30   : > { %p1646_p10 = pnand %p1645_p1, %p1639_p2 }
  0x32   : > { %1649 = shalt.err (!%p1646_p10)
}
  0x33   : > { %s1650_s7 = scalar_lea.vmem %s2011_s19, 64  ;;  %s1831_s18 = smov [#allocation6]  }
  0x34   : > { %p1651_p13 = scmp.ne.s32.totalorder %s2011_s19, %s1650_s7  ;;  %s1655_s9 = sshll.u32 %s1831_s18, 4  ;;  %s1656_s9 = int_to_ptr.vmem [resolvable:$false] %s1655_s9 }
  0x35   : > { %s1657_s12 = scalar_lea.vmem %s1656_s9, 128  ;;  %p1658_p5 = scmp.lt.s32.totalorder %s2011_s19, %s1656_s9 }
  0x36   : > { %p1653_p11 = pnand %p1651_p13, %p1637_p12  ;;  %p1659_p0 = scmp.lt.s32.totalorder %s1657_s12, %s1650_s7 }
  0x38   : > { %p1654_p6 = pneg %p1653_p11  ;;  %p1660_p3 = por %p1659_p0, %p1658_p5 }
  0x3a   : > { %p1661_p8 = pnand %p1660_p3, %p1654_p6 }
  0x3c   : > { %1664 = shalt.err (!%p1661_p8)
}
  0x3d   : > { %1506 = dma.hbm_to_vmem [thread:$0]  (!%p2017_p4), %s2009_s5, 64, %s2011_s19, %s177_s10  }
  0x3e   : > { %p2363_p2 = scmp.lt.s32.totalorder %s1829_s6, 3  ;;  %p2364_p5 = scmp.ge.s32.totalorder %s1829_s6, 1 }
  0x3f   : > { %s109_s24 = sadd.s32 1, %s1805_s0  ;;  %p116_p10 = scmp.ne.s32.totalorder %s1805_s0, %s1801_s26 }
  0x40   : > { %p2052_p6 = pnand %p2364_p5, %p2363_p2  ;;  %p122_p1 = scmp.ne.s32.totalorder %s1801_s26, %s1797_s25 }
  0x41   : > { %s2060_s20 = scalar_select %p1975_p7, %s1805_s0, %s109_s24  }
  0x42   : > { %s208_s11 = sand.u32 1, %s1805_s0   ;;  %s217_s13 = sadd.s32 %s1825_s30, %s1967_s15 }
  0x43   : > { %p2366_p9 = scmp.eq.s32.totalorder %s1829_s6, 0  ;;  %p2367_p13 = scmp.ne.s32.totalorder %s2355_s14, 0 }
  0x44   : > { %s1333_s19 = sshll.u32 %s208_s11, 2  ;;  %s1334_s10 = sshll.u32 %s217_s13, 6 }
  0x45   : > { %p118_p12 = por %p116_p10, %p2366_p9  ;;  %p2073_p11 = por %p122_p1, %p2367_p13 }
  0x46   : > { %s2080_s9 = scalar_lea.hbm %s2340_s4, %s1334_s10  ;;  %s212_s25 = scalar_lea.vmem [#allocation9], %s1333_s19 }
  0x47   : > { %s2368_s5 = scalar_select %p2073_p11, 1, 0 }
  0x48   : > { %s221_s15 = sshll.u32 %s212_s25, 4  ;;  %p2369_p7 = scmp.lt.s32.totalorder %s1829_s6, 2  ;;  %s2082_s15 = int_to_ptr.vmem [resolvable:$true] %s221_s15 }
  0x49   : > { %s209_s17 = scalar_lea.sflag [#allocation10], %s208_s11  ;;  %s1665_s12 = scalar_lea.hbm %s2080_s9, 64 }
  0x4a   : > { %p2086_p4 = pnand %p2369_p7, %p118_p12  ;;  %p1666_p0 = scmp.ne.s32.totalorder %s2080_s9, %s1665_s12 }
  0x4b   : > { %s1670_s19 = scalar_lea.hbm %s2340_s4, 128  ;;  %p1671_p5 = scmp.lt.u32.totalorder %s2080_s9, %s2340_s4 }
  0x4c   : > { %p1667_p3 = pneg %p2086_p4  ;;  %p1672_p10 = scmp.lt.u32.totalorder %s1670_s19, %s1665_s12 }
  0x4d   : > { %p1674_p9 = scmp.lt.u32.totalorder %s1665_s12, %s2080_s9 }
  0x4e   : > { %p1668_p8 = pnand %p1667_p3, %p1666_p0  ;;  %p1673_p1 = por %p1672_p10, %p1671_p5 }
  0x50   : > { %p1669_p2 = pneg %p1668_p8  ;;  %p1675_p12 = por %p1674_p9, %p1673_p1 }
  0x52   : > { %p1676_p13 = pnand %p1675_p12, %p1669_p2 }
  0x54   : > { %1679 = shalt.err (!%p1676_p13)
}
  0x55   : > { %s1680_s11 = scalar_lea.vmem %s2082_s15, 64  ;;  %s1832_s18 = smov [#allocation9]  }
  0x56   : > { %p1681_p7 = scmp.ne.s32.totalorder %s2082_s15, %s1680_s11  ;;  %s1685_s25 = sshll.u32 %s1832_s18, 4  ;;  %s1686_s25 = int_to_ptr.vmem [resolvable:$false] %s1685_s25 }
  0x57   : > { %s1687_s24 = scalar_lea.vmem %s1686_s25, 128  ;;  %p1688_p11 = scmp.lt.s32.totalorder %s2082_s15, %s1686_s25 }
  0x58   : > { %p1683_p0 = pnand %p1681_p7, %p1667_p3  ;;  %p1689_p5 = scmp.lt.s32.totalorder %s1687_s24, %s1680_s11 }
  0x5a   : > { %p1684_p8 = pneg %p1683_p0  ;;  %p1690_p10 = por %p1689_p5, %p1688_p11 }
  0x5c   : > { %p1691_p1 = pnand %p1690_p10, %p1684_p8 }
  0x5e   : > { %1694 = shalt.err (!%p1691_p1)
}
  0x5f   : > { %1509 = dma.hbm_to_vmem [thread:$0]  (!%p2086_p4), %s2080_s9, 64, %s2082_s15, %s209_s17  }
  0x60   : > { %230 = sbr.rel (%p2052_p6) target bundleno = 1761 (0x6e1), region = 32  ;;  %s232_s12 = sand.u32 (!%p2052_p6), 1, %s1813_s1  }
  0x61   : > { %s2118_s13 = sshll.u32 (!%p2052_p6), %s232_s12, 2  ;;  %s233_s19 = scalar_lea.sflag (!%p2052_p6), [#allocation7], %s232_s12 }
  0x62   : > { %s236_s10 = scalar_lea.vmem (!%p2052_p6), [#allocation6], %s2118_s13  ;;  %p2371_p3 = scmp.ne.s32.totalorder (!%p2052_p6), %s2356_s16, 0 }
  0x67   : > { %1772 = dma.done.wait (%p2371_p3), %s233_s19, 64  }
  0x68   : > { %1774 = vsyncadd (%p2371_p3), %s233_s19, 4294967232  ;;  %s241_s14 = sand.u32 1, %s1801_s26   ;;  %p2372_p6 = scmp.ne.s32.totalorder %s2368_s5, 0 }
  0x69   : > { %s2126_s9 = sshll.u32 %s241_s14, 2  ;;  %s242_s8 = scalar_lea.sflag [#allocation10], %s241_s14 }
  0x6a   : > { %s245_s15 = scalar_lea.vmem [#allocation9], %s2126_s9 }
  0x6b   : > { %1776 = dma.done.wait (%p2372_p6), %s242_s8, 64  }
  0x6c   : > { %1778 = vsyncadd (%p2372_p6), %s242_s8, 4294967232  ;;  %s278_s17 = sand.u32 1, %s1789_s23   ;;  %s2134_s16 = sld [smem:[#allocation5]] }
  0x6d   : > { %s2136_s7 = sld [smem:[#allocation4]]  ;;  %p283_p11 = scmp.lt.s32.totalorder %s1821_s29, 1 }
  0x6e   : > { %s2141_s11 = sshll.u32 %s278_s17, 3 }
  0x6f   : > { %s284_s18 = scalar_select %p283_p11, %s1821_s29, 1 }
  0x70   : > { %s280_s8 = scalar_lea.vmem [#allocation11], %s2141_s11 }
  0x72   : > { %p285_p4 = scmp.lt.s32.totalorder %s2134_s16, 0  ;;  %p1340_p2 = scmp.ne.s32.totalorder %s2134_s16, 0 }
  0x73   : > { %vm300_vm0 = vcmask (!%p1340_p2), 261120   ;;  %v1833_v0 = vmov (!%p1340_p2), 0.0  }
  0x74   : > { %s286_s5 = scalar_select %p285_p4, %s2134_s16, 0 }
  0x75   : > { %299 = sbr.rel (%p1340_p2) target bundleno = 124 (0x7c), region = 44  ;;  %301 = vst.msk [vmem:[#allocation2] sm:$0xff] (!%p1340_p2), %vm300_vm0, %v1833_v0 }
  0x76   : > { %s287_s25 = sadd.s32 %s286_s5, %s284_s18 }
  0x77   : > { %s1339_s24 = sshll.u32 %s287_s25, 2 }
  0x78   : > { %s2149_s14 = scalar_lea.vmem %s2339_s3, %s1339_s24 }
  0x7c PF: > { %p1341_p9 = scmp.eq.s32.totalorder %s2134_s16, %s2136_s7 }
  0x7d   : > { %v307_v1 = vld [vmem:[%s2149_s14] sm:$0xf] (!%p1341_p9)  ;;  %vm309_vm1 = vcmask (!%p1341_p9), 64512   ;;  %v1834_v2 = vmov (!%p1341_p9), 0.0   ;;  %vm1835_vm2 = vmmov (!%p1341_p9), 0   ;;  %vm362_vm3 = vcmask (!%p1341_p9), 1043456  }
  0x7e   : > { %305 = sbr.rel (%p1341_p9) target bundleno = 924 (0x39c), region = 48  ;;  %1401 = vmatprep.subr.bf16.mxu0 (!%p1341_p9), %v1834_v2  ;;  %v314_v3 = vsel (!%p1341_p9), %vm309_vm1, %v307_v1, 0  ;;  %v1345_v4 = vcombine.low (!%p1341_p9), %v307_v1, %v307_v1  ;;  %1403 = vmatprep.mubr.msk.bf16.mxu0 (!%p1341_p9), %vm1835_vm2, %v1834_v2  ;;  %v306_v5 = vld [vmem:[%s236_s10] sm:$0xf] (!%p1341_p9)  ;;  %v308_v6 = vld [vmem:[%s245_s15] sm:$0xf] (!%p1341_p9) }
  0x7f   : > { %1402 = vmatpush3.bf16.xpose.msra.mxu0 (!%p1341_p9), %v314_v3  ;;  %1407 = vmatprep.subr.bf16.mxu1 (!%p1341_p9), %v1834_v2  ;;  %s1836_s18 = smov (!%p1341_p9), 120   ;;  %s1837_s5 = smov (!%p1341_p9), 112   ;;  %v1344_v7 = vcombine.low (!%p1341_p9), %v306_v5, %v306_v5  ;;  %v364_v8 = vsel (!%p1341_p9), %vm362_vm3, %v308_v6, 0  ;;  %v1347_v9 = vcombine.low (!%p1341_p9), %v308_v6, %v308_v6  ;;  %v357_v27 = vld [vmem:[#allocation2] sm:$0xff] (!%p1341_p9)  ;;  %vm523_vm4 = vcmask (!%p1341_p9), 130112  }
  0x80   : > { %416 = vrot.lane.b32.xlu0 (!%p1341_p9), %v1345_v4, %s1836_s18  ;;  %527 = vrot.lane.b32.xlu1 (!%p1341_p9), %v1345_v4, %s1837_s5  ;;  %s1838_s25 = smov (!%p1341_p9), 104   ;;  %s1839_s24 = smov (!%p1341_p9), 8   ;;  %vm631_vm5 = vcmask (!%p1341_p9), 195712   ;;  %vm739_vm6 = vcmask (!%p1341_p9), 261312  }
  0x81   : > { %1408 = vmatpush3.bf16.msra.mxu1 (!%p1341_p9), %v364_v8  ;;  %1409 = vmatprep.mubr.msk.bf16.mxu1 (!%p1341_p9), %vm1835_vm2, %v1834_v2  ;;  %s1840_s12 = smov (!%p1341_p9), 16   ;;  %s1841_s19 = smov (!%p1341_p9), 24  }
  0x82   : > { %1413 = vmatprep.subr.bf16.mxu1 (!%p1341_p9), %v1834_v2  ;;  %1419 = vmatprep.subr.bf16.mxu0 (!%p1341_p9), %v1834_v2 }
  0x84   : > { %411 = vrot.lane.b32.xlu0 (!%p1341_p9), %v1344_v7, %s1836_s18  ;;  %525 = vrot.lane.b32.xlu1 (!%p1341_p9), %v1344_v7, %s1837_s5 }
  0x86   : > { %1404 = vmatmul.mubr.msk.bf16.vlgmr.msra.gmra.mrb[0].mxu0 %vm309_vm1, %v306_v5 }
  0x87   : > { %1421 = vmatprep.mubr.msk.bf16.mxu0 %vm1835_vm2, %v1834_v2 }
  0x88   : > { %635 = vrot.lane.b32.xlu0 %v1345_v4, %s1838_s25  ;;  %633 = vrot.lane.b32.xlu1 %v1344_v7, %s1838_s25 }
  0x8c   : > { %470 = vrot.lane.b32.xlu0 %v1347_v9, %s1836_s18  ;;  %578 = vrot.lane.b32.xlu1 %v1347_v9, %s1837_s5 }
  0x90   : > { %686 = vrot.lane.b32.xlu0 %v1347_v9, %s1838_s25 }
  0xf2   : > { %v417_v11 = vpop.permute.xlu0 %416  ;;  %v528_v18 = vpop.permute.xlu1 %527 }
  0xf3   : > { %v422_v16 = vsel %vm309_vm1, %v417_v11, 0  ;;  %v533_v20 = vsel %vm309_vm1, %v528_v18, 0 }
  0xf6   : > { %v412_v19 = vpop.permute.xlu0 %411  ;;  %v526_v22 = vpop.permute.xlu1 %525 }
  0xfa   : > { %v636_v21 = vpop.permute.xlu0 %635  ;;  %v634_v24 = vpop.permute.xlu1 %633 }
  0xfb   : > { %v641_v23 = vsel %vm309_vm1, %v636_v21, 0 }
  0xfe   : > { %v471_v25 = vpop.permute.xlu0 %470  ;;  %v579_v34 = vpop.permute.xlu1 %578 }
  0xff   : > { %v476_v26 = vsel %vm362_vm3, %v471_v25, 0  ;;  %v584_v40 = vsel %vm362_vm3, %v579_v34, 0 }
 0x100   : > { %1420 = vmatpush3.bf16.msra.mxu0 %v476_v26 }
 0x101   : > { %1431 = vmatprep.subr.bf16.mxu0 %v1834_v2 }
 0x102   : > { %v687_v42 = vpop.permute.xlu0 %686 }
 0x103   : > { %v692_v48 = vsel %vm362_vm3, %v687_v42, 0 }
 0x159   : > { %v350_v10 = vpop.f32.mrb[0].mxu0 }
 0x15a   : > { %v356_v12 = vmax.f32 %v350_v10, 0.0  ;;  %v1405_v13 = vpop.f32.mrb[1].mxu0 }
 0x15b   : > { %v353_v14 = vpop.f32.mrb[2].mxu0 }
 0x15c   : > { %v358_v15 = vpack.c.bf16 %v356_v12, %v356_v12  ;;  %v1406_v17 = vpop.f32.mrb[3].mxu0 }
 0x15e   : > { %1410 = vmatmul.mubr.msk.bf16.vlgmr.msra.gmra.mrb[0].mxu1 %vm309_vm1, %v358_v15 }
 0x15f   : > { %1414 = vmatpush3.bf16.xpose.msra.mxu1 %v422_v16  ;;  %1415 = vmatprep.mubr.msk.bf16.mxu1 %vm1835_vm2, %v1834_v2 }
 0x160   : > { %1425 = vmatprep.subr.bf16.mxu1 %v1834_v2 }
 0x166   : > { %1416 = vmatmul.mubr.msk.bf16.vlgmr.msra.gmra.mrb[4].mxu1 %vm309_vm1, %v412_v19 }
 0x167   : > { %1426 = vmatpush3.bf16.xpose.msra.mxu1 %v533_v20  ;;  %1427 = vmatprep.mubr.msk.bf16.mxu1 %vm1835_vm2, %v1834_v2 }
 0x168   : > { %1437 = vmatprep.subr.bf16.mxu1 %v1834_v2 }
 0x16e   : > { %1428 = vmatmul.mubr.msk.bf16.vlgmr.msra.gmra.mrb[8].mxu1 %vm309_vm1, %v526_v22 }
 0x16f   : > { %1438 = vmatpush3.bf16.xpose.msra.mxu1 %v641_v23  ;;  %1439 = vmatprep.mubr.msk.bf16.mxu1 %vm1835_vm2, %v1834_v2 }
 0x176   : > { %1440 = vmatmul.mubr.msk.bf16.vlgmr.msra.gmra.mrb[12].mxu1 %vm309_vm1, %v634_v24 }
 0x231   : > { %v400_v28 = vpop.f32.mrb[0].mxu1 }
 0x232   : > { %v406_v29 = vadd.f32 %v400_v28, %v357_v27  ;;  %v1411_v30 = vpop.f32.mrb[1].mxu1 }
 0x233   : > { %v403_v31 = vpop.f32.mrb[2].mxu1 }
 0x234   : > { %407 = vst.msk [vmem:[#allocation2] sm:$0xff] %vm309_vm1, %v406_v29  ;;  %v1412_v32 = vpop.f32.mrb[3].mxu1 }
 0x239   : > { %v458_v33 = vpop.f32.mrb[4].mxu1 }
 0x23a   : > { %v464_v35 = vmax.f32 %v458_v33, 0.0  ;;  %v1417_v36 = vpop.f32.mrb[5].mxu1 }
 0x23b   : > { %v461_v37 = vpop.f32.mrb[6].mxu1  ;;  %v465_v3 = vld [vmem:[#allocation2] sm:$0xff] }
 0x23c   : > { %v466_v38 = vpack.c.bf16 %v464_v35, %v464_v35  ;;  %v1418_v39 = vpop.f32.mrb[7].mxu1 }
 0x23e   : > { %1422 = vmatmul.mubr.msk.bf16.vlgmr.msra.gmra.mrb[4].mxu0 %vm309_vm1, %v466_v38 }
 0x23f   : > { %1432 = vmatpush3.bf16.msra.mxu0 %v584_v40  ;;  %1433 = vmatprep.mubr.msk.bf16.mxu0 %vm1835_vm2, %v1834_v2 }
 0x240   : > { %1443 = vmatprep.subr.bf16.mxu0 %v1834_v2 }
 0x241   : > { %v569_v41 = vpop.f32.mrb[8].mxu1 }
 0x242   : > { %v575_v43 = vmax.f32 %v569_v41, 0.0  ;;  %v1429_v44 = vpop.f32.mrb[9].mxu1 }
 0x243   : > { %v572_v45 = vpop.f32.mrb[10].mxu1 }
 0x244   : > { %v577_v46 = vpack.c.bf16 %v575_v43, %v575_v43  ;;  %v1430_v47 = vpop.f32.mrb[11].mxu1 }
 0x246   : > { %1434 = vmatmul.mubr.msk.bf16.vlgmr.msra.gmra.mrb[8].mxu0 %vm309_vm1, %v577_v46 }
 0x247   : > { %1444 = vmatpush3.bf16.msra.mxu0 %v692_v48  ;;  %1445 = vmatprep.mubr.msk.bf16.mxu0 %vm1835_vm2, %v1834_v2 }
 0x249   : > { %v677_v49 = vpop.f32.mrb[12].mxu1 }
 0x24a   : > { %v683_v50 = vmax.f32 %v677_v49, 0.0  ;;  %v1441_v51 = vpop.f32.mrb[13].mxu1 }
 0x24b   : > { %v680_v52 = vpop.f32.mrb[14].mxu1 }
 0x24c   : > { %v685_v53 = vpack.c.bf16 %v683_v50, %v683_v50  ;;  %v1442_v54 = vpop.f32.mrb[15].mxu1 }
 0x24e   : > { %1446 = vmatmul.mubr.msk.bf16.vlgmr.msra.gmra.mrb[12].mxu0 %vm309_vm1, %v685_v53 }
 0x311   : > { %v512_v55 = vpop.f32.mrb[4].mxu0 }
 0x312   : > { %519 = vrot.lane.b32.xlu1 %v512_v55, %s1839_s24  ;;  %v1423_v56 = vpop.f32.mrb[5].mxu0 }
 0x313   : > { %v515_v57 = vpop.f32.mrb[6].mxu0 }
 0x314   : > { %v1424_v58 = vpop.f32.mrb[7].mxu0 }
 0x319   : > { %v620_v59 = vpop.f32.mrb[8].mxu0 }
 0x31a   : > { %v1435_v60 = vpop.f32.mrb[9].mxu0  ;;  %627 = vrot.lane.b32.xlu0 %v620_v59, %s1840_s12 }
 0x31b   : > { %v623_v61 = vpop.f32.mrb[10].mxu0 }
 0x31c   : > { %v1436_v62 = vpop.f32.mrb[11].mxu0 }
 0x321   : > { %v728_v63 = vpop.f32.mrb[12].mxu0 }
 0x322   : > { %v1447_v0 = vpop.f32.mrb[13].mxu0  ;;  %735 = vrot.lane.b32.xlu1 %v728_v63, %s1841_s19 }
 0x323   : > { %v731_v1 = vpop.f32.mrb[14].mxu0 }
 0x324   : > { %v1448_v2 = vpop.f32.mrb[15].mxu0 }
 0x384   : > { %v520_v4 = vpop.permute.xlu1 %519 }
 0x385   : > { %v522_v5 = vadd.f32 %v520_v4, %v465_v3 }
 0x387   : > { %524 = vst.msk [vmem:[#allocation2] sm:$0xff] %vm523_vm4, %v522_v5 }
 0x38c   : > { %v628_v6 = vpop.permute.xlu0 %627 }
 0x38e   : > { %v576_v7 = vld [vmem:[#allocation2] sm:$0xff] }
 0x38f   : > { %v630_v8 = vadd.f32 %v628_v6, %v576_v7 }
 0x391   : > { %632 = vst.msk [vmem:[#allocation2] sm:$0xff] %vm631_vm5, %v630_v8 }
 0x394   : > { %v736_v9 = vpop.permute.xlu1 %735 }
 0x398   : > { %v684_v10 = vld [vmem:[#allocation2] sm:$0xff] }
 0x399   : > { %v738_v11 = vadd.f32 %v736_v9, %v684_v10 }
 0x39b   : > { %740 = vst.msk [vmem:[#allocation2] sm:$0xff] %vm739_vm6, %v738_v11 }
 0x39c PF: > { %p1353_p12 = scmp.ne.s32.totalorder %s2134_s16, %s2136_s7 }
 0x39d   : > { %v746_v12 = vld [vmem:[%s2149_s14] sm:$0xf] (!%p1353_p12)  ;;  %vm753_vm7 = vcmask (!%p1353_p12), 64512   ;;  %v1842_v13 = vmov (!%p1353_p12), 0.0   ;;  %vm1843_vm8 = vmmov (!%p1353_p12), 0   ;;  %vm807_vm9 = vcmask (!%p1353_p12), 1043456  }
 0x39e   : > { %744 = sbr.rel (%p1353_p12) target bundleno = 1734 (0x6c6), region = 52  ;;  %1449 = vmatprep.subr.bf16.mxu0 (!%p1353_p12), %v1842_v13  ;;  %v758_v14 = vsel (!%p1353_p12), %vm753_vm7, %v746_v12, 0  ;;  %v1357_v15 = vcombine.low (!%p1353_p12), %v746_v12, %v746_v12  ;;  %1451 = vmatprep.mubr.msk.bf16.mxu0 (!%p1353_p12), %vm1843_vm8, %v1842_v13  ;;  %v745_v16 = vld [vmem:[%s236_s10] sm:$0xf] (!%p1353_p12)  ;;  %v747_v17 = vld [vmem:[%s245_s15] sm:$0xf] (!%p1353_p12)  ;;  %v748_v21 = vlaneseq (!%p1353_p12) }
 0x39f   : > { %1450 = vmatpush3.bf16.xpose.msra.mxu0 (!%p1353_p12), %v758_v14  ;;  %1455 = vmatprep.subr.bf16.mxu1 (!%p1353_p12), %v1842_v13  ;;  %s1844_s16 = smov (!%p1353_p12), 120   ;;  %s1845_s7 = smov (!%p1353_p12), 112   ;;  %v1356_v18 = vcombine.low (!%p1353_p12), %v745_v16, %v745_v16  ;;  %v809_v19 = vsel (!%p1353_p12), %vm807_vm9, %v747_v17, 0  ;;  %v1359_v20 = vcombine.low (!%p1353_p12), %v747_v17, %v747_v17  ;;  %vm969_vm11 = vcmask (!%p1353_p12), 130112  }
 0x3a0   : > { %861 = vrot.lane.b32.xlu0 (!%p1353_p12), %v1357_v15, %s1844_s16  ;;  %973 = vrot.lane.b32.xlu1 (!%p1353_p12), %v1357_v15, %s1845_s7  ;;  %s1846_s13 = smov (!%p1353_p12), 104   ;;  %v2221_v22 = vshrl.u32 (!%p1353_p12), %v748_v21, 7  ;;  %v2223_v23 = vand.u32 (!%p1353_p12), 127, %v748_v21  ;;  %s1847_s10 = smov (!%p1353_p12), 8   ;;  %vm1078_vm12 = vcmask (!%p1353_p12), 195712   ;;  %vm1187_vm13 = vcmask (!%p1353_p12), 261312  }
 0x3a1   : > { %1456 = vmatpush3.bf16.msra.mxu1 (!%p1353_p12), %v809_v19  ;;  %1457 = vmatprep.mubr.msk.bf16.mxu1 (!%p1353_p12), %vm1843_vm8, %v1842_v13  ;;  %s1848_s9 = smov (!%p1353_p12), 16   ;;  %s1849_s15 = smov (!%p1353_p12), 24   ;;  %vm1190_vm14 = vcmask (!%p1353_p12), 261120  }
 0x3a2   : > { %1461 = vmatprep.subr.bf16.mxu1 (!%p1353_p12), %v1842_v13  ;;  %1467 = vmatprep.subr.bf16.mxu0 (!%p1353_p12), %v1842_v13  ;;  %vm752_vm10 = vcmp.le.s32.totalorder (!%p1353_p12), %v2223_v23, %v2221_v22  ;;  %v802_v42 = vld [vmem:[#allocation2] sm:$0xff] (!%p1353_p12) }
 0x3a4   : > { %856 = vrot.lane.b32.xlu0 (!%p1353_p12), %v1356_v18, %s1844_s16  ;;  %971 = vrot.lane.b32.xlu1 (!%p1353_p12), %v1356_v18, %s1845_s7 }
 0x3a6   : > { %1452 = vmatmul.mubr.msk.bf16.vlgmr.msra.gmra.mrb[0].mxu0 %vm753_vm7, %v745_v16 }
 0x3a7   : > { %1469 = vmatprep.mubr.msk.bf16.mxu0 %vm1843_vm8, %v1842_v13 }
 0x3a8   : > { %1082 = vrot.lane.b32.xlu0 %v1357_v15, %s1846_s13  ;;  %1080 = vrot.lane.b32.xlu1 %v1356_v18, %s1846_s13 }
 0x3ac   : > { %916 = vrot.lane.b32.xlu0 %v1359_v20, %s1844_s16  ;;  %1025 = vrot.lane.b32.xlu1 %v1359_v20, %s1845_s7 }
 0x3b0   : > { %1134 = vrot.lane.b32.xlu0 %v1359_v20, %s1846_s13 }
 0x412   : > { %v862_v27 = vpop.permute.xlu0 %861  ;;  %v974_v33 = vpop.permute.xlu1 %973 }
 0x413   : > { %v867_v32 = vsel %vm753_vm7, %v862_v27, 0  ;;  %v979_v35 = vsel %vm753_vm7, %v974_v33, 0 }
 0x416   : > { %v857_v34 = vpop.permute.xlu0 %856  ;;  %v972_v37 = vpop.permute.xlu1 %971 }
 0x41a   : > { %v1083_v36 = vpop.permute.xlu0 %1082  ;;  %v1081_v39 = vpop.permute.xlu1 %1080 }
 0x41b   : > { %v1088_v38 = vsel %vm753_vm7, %v1083_v36, 0 }
 0x41e   : > { %v917_v40 = vpop.permute.xlu0 %916  ;;  %v1026_v51 = vpop.permute.xlu1 %1025 }
 0x41f   : > { %v922_v41 = vsel %vm807_vm9, %v917_v40, 0  ;;  %v1031_v56 = vsel %vm807_vm9, %v1026_v51, 0 }
 0x420   : > { %1468 = vmatpush3.bf16.msra.mxu0 %v922_v41 }
 0x421   : > { %1479 = vmatprep.subr.bf16.mxu0 %v1842_v13 }
 0x422   : > { %v1135_v60 = vpop.permute.xlu0 %1134 }
 0x423   : > { %v1140_v1 = vsel %vm807_vm9, %v1135_v60, 0 }
 0x479   : > { %v794_v24 = vpop.f32.mrb[0].mxu0 }
 0x47a   : > { %v800_v25 = vmax.f32 %v794_v24, 0.0  ;;  %v1453_v26 = vpop.f32.mrb[1].mxu0 }
 0x47b   : > { %v797_v28 = vpop.f32.mrb[2].mxu0 }
 0x47c   : > { %v801_v29 = vsel %vm752_vm10, %v800_v25, 0.0  ;;  %v1454_v30 = vpop.f32.mrb[3].mxu0 }
 0x47d   : > { %v803_v31 = vpack.c.bf16 %v801_v29, %v801_v29 }
 0x47f   : > { %1458 = vmatmul.mubr.msk.bf16.vlgmr.msra.gmra.mrb[0].mxu1 %vm753_vm7, %v803_v31 }
 0x480   : > { %1462 = vmatpush3.bf16.xpose.msra.mxu1 %v867_v32  ;;  %1463 = vmatprep.mubr.msk.bf16.mxu1 %vm1843_vm8, %v1842_v13 }
 0x481   : > { %1473 = vmatprep.subr.bf16.mxu1 %v1842_v13 }
 0x487   : > { %1464 = vmatmul.mubr.msk.bf16.vlgmr.msra.gmra.mrb[4].mxu1 %vm753_vm7, %v857_v34 }
 0x488   : > { %1474 = vmatpush3.bf16.xpose.msra.mxu1 %v979_v35  ;;  %1475 = vmatprep.mubr.msk.bf16.mxu1 %vm1843_vm8, %v1842_v13 }
 0x489   : > { %1485 = vmatprep.subr.bf16.mxu1 %v1842_v13 }
 0x48f   : > { %1476 = vmatmul.mubr.msk.bf16.vlgmr.msra.gmra.mrb[8].mxu1 %vm753_vm7, %v972_v37 }
 0x490   : > { %1486 = vmatpush3.bf16.xpose.msra.mxu1 %v1088_v38  ;;  %1487 = vmatprep.mubr.msk.bf16.mxu1 %vm1843_vm8, %v1842_v13 }
 0x497   : > { %1488 = vmatmul.mubr.msk.bf16.vlgmr.msra.gmra.mrb[12].mxu1 %vm753_vm7, %v1081_v39 }
 0x552   : > { %v845_v43 = vpop.f32.mrb[0].mxu1 }
 0x553   : > { %v851_v44 = vadd.f32 %v845_v43, %v802_v42  ;;  %v1459_v45 = vpop.f32.mrb[1].mxu1 }
 0x554   : > { %v848_v46 = vpop.f32.mrb[2].mxu1 }
 0x555   : > { %852 = vst.msk [vmem:[#allocation2] sm:$0xff] %vm753_vm7, %v851_v44  ;;  %v1460_v47 = vpop.f32.mrb[3].mxu1 }
 0x55a   : > { %v903_v48 = vpop.f32.mrb[4].mxu1 }
 0x55b   : > { %v909_v49 = vmax.f32 %v903_v48, 0.0  ;;  %v1465_v50 = vpop.f32.mrb[5].mxu1 }
 0x55c   : > { %v906_v52 = vpop.f32.mrb[6].mxu1  ;;  %v911_v21 = vld [vmem:[#allocation2] sm:$0xff] }
 0x55d   : > { %v910_v53 = vsel %vm752_vm10, %v909_v49, 0.0  ;;  %v1466_v54 = vpop.f32.mrb[7].mxu1 }
 0x55e   : > { %v912_v55 = vpack.c.bf16 %v910_v53, %v910_v53 }
 0x560   : > { %1470 = vmatmul.mubr.msk.bf16.vlgmr.msra.gmra.mrb[4].mxu0 %vm753_vm7, %v912_v55 }
 0x561   : > { %1480 = vmatpush3.bf16.msra.mxu0 %v1031_v56  ;;  %1481 = vmatprep.mubr.msk.bf16.mxu0 %vm1843_vm8, %v1842_v13 }
 0x562   : > { %v1015_v57 = vpop.f32.mrb[8].mxu1  ;;  %1491 = vmatprep.subr.bf16.mxu0 %v1842_v13 }
 0x563   : > { %v1021_v58 = vmax.f32 %v1015_v57, 0.0  ;;  %v1477_v59 = vpop.f32.mrb[9].mxu1 }
 0x564   : > { %v1018_v61 = vpop.f32.mrb[10].mxu1 }
 0x565   : > { %v1022_v62 = vsel %vm752_vm10, %v1021_v58, 0.0  ;;  %v1478_v63 = vpop.f32.mrb[11].mxu1 }
 0x566   : > { %v1024_v0 = vpack.c.bf16 %v1022_v62, %v1022_v62 }
 0x568   : > { %1482 = vmatmul.mubr.msk.bf16.vlgmr.msra.gmra.mrb[8].mxu0 %vm753_vm7, %v1024_v0 }
 0x569   : > { %1492 = vmatpush3.bf16.msra.mxu0 %v1140_v1  ;;  %1493 = vmatprep.mubr.msk.bf16.mxu0 %vm1843_vm8, %v1842_v13 }
 0x56a   : > { %v1124_v2 = vpop.f32.mrb[12].mxu1 }
 0x56b   : > { %v1130_v3 = vmax.f32 %v1124_v2, 0.0  ;;  %v1489_v4 = vpop.f32.mrb[13].mxu1 }
 0x56c   : > { %v1127_v5 = vpop.f32.mrb[14].mxu1 }
 0x56d   : > { %v1131_v6 = vsel %vm752_vm10, %v1130_v3, 0.0  ;;  %v1490_v7 = vpop.f32.mrb[15].mxu1 }
 0x56e   : > { %v1133_v8 = vpack.c.bf16 %v1131_v6, %v1131_v6 }
 0x570   : > { %1494 = vmatmul.mubr.msk.bf16.vlgmr.msra.gmra.mrb[12].mxu0 %vm753_vm7, %v1133_v8 }
 0x633   : > { %v958_v9 = vpop.f32.mrb[4].mxu0 }
 0x634   : > { %965 = vrot.lane.b32.xlu1 %v958_v9, %s1847_s10  ;;  %v1471_v10 = vpop.f32.mrb[5].mxu0 }
 0x635   : > { %v961_v11 = vpop.f32.mrb[6].mxu0 }
 0x636   : > { %v1472_v12 = vpop.f32.mrb[7].mxu0 }
 0x63b   : > { %v1067_v14 = vpop.f32.mrb[8].mxu0 }
 0x63c   : > { %v1483_v13 = vpop.f32.mrb[9].mxu0  ;;  %1074 = vrot.lane.b32.xlu0 %v1067_v14, %s1848_s9 }
 0x63d   : > { %v1070_v15 = vpop.f32.mrb[10].mxu0 }
 0x63e   : > { %v1484_v16 = vpop.f32.mrb[11].mxu0 }
 0x643   : > { %v1176_v17 = vpop.f32.mrb[12].mxu0 }
 0x644   : > { %v1495_v18 = vpop.f32.mrb[13].mxu0  ;;  %1183 = vrot.lane.b32.xlu1 %v1176_v17, %s1849_s15 }
 0x645   : > { %v1179_v19 = vpop.f32.mrb[14].mxu0 }
 0x646   : > { %v1496_v20 = vpop.f32.mrb[15].mxu0 }
 0x6a6   : > { %v966_v22 = vpop.permute.xlu1 %965 }
 0x6a7   : > { %v968_v23 = vadd.f32 %v966_v22, %v911_v21 }
 0x6a9   : > { %970 = vst.msk [vmem:[#allocation2] sm:$0xff] %vm969_vm11, %v968_v23 }
 0x6ae   : > { %v1075_v24 = vpop.permute.xlu0 %1074 }
 0x6b0   : > { %v1023_v25 = vld [vmem:[#allocation2] sm:$0xff] }
 0x6b1   : > { %v1077_v26 = vadd.f32 %v1075_v24, %v1023_v25 }
 0x6b3   : > { %1079 = vst.msk [vmem:[#allocation2] sm:$0xff] %vm1078_vm12, %v1077_v26 }
 0x6b6   : > { %v1184_v27 = vpop.permute.xlu1 %1183 }
 0x6ba   : > { %v1132_v28 = vld [vmem:[#allocation2] sm:$0xff] }
 0x6bb   : > { %v1186_v29 = vadd.f32 %v1184_v27, %v1132_v28 }
 0x6bd   : > { %1188 = vst.msk [vmem:[#allocation2] sm:$0xff] %vm1187_vm13, %v1186_v29 }
 0x6c4   : > { %v1189_v30 = vld [vmem:[#allocation2] sm:$0xff] }
 0x6c5   : > { %1191 = vst.msk [vmem:[%s280_s8] sm:$0xff] %vm1190_vm14, %v1189_v30 }
 0x6c6 PF: > { %s1200_s14 = sld [smem:[#allocation4]]  ;;  %s1208_s18 = sshll.u32 %s280_s8, 4  ;;  %s2272_s18 = int_to_ptr.vmem [resolvable:$true] %s1208_s18 }
 0x6c7   : > { %s2373_s19 = sld [smem:[#allocation19_spill]]  ;;  %s1193_s7 = scalar_lea.sflag [#allocation8], %s278_s17 }
 0x6c8   : > { %s1695_s13 = scalar_lea.vmem %s2272_s18, 128  ;;  %p2374_p7 = scmp.ne.s32.totalorder %s2360_s21, 0 }
 0x6c9   : > { %p1696_p13 = scmp.ne.s32.totalorder %s2272_s18, %s1695_s13  ;;  %s1850_s11 = smov [#allocation11]  }
 0x6ca   : > { %s1699_s8 = sshll.u32 %s1850_s11, 4  ;;  %s1700_s8 = int_to_ptr.vmem [resolvable:$false] %s1699_s8 }
 0x6cb   : > { %p1697_p0 = pnand %p1696_p13, %p2374_p7  ;;  %p1702_p5 = scmp.lt.s32.totalorder %s2272_s18, %s1700_s8 }
 0x6cc   : > { %s1204_s5 = sadd.s32 %s1821_s29, %s1200_s14  ;;  %s1701_s29 = scalar_lea.vmem %s1700_s8, 256 }
 0x6cd   : > { %s1366_s25 = sshll.u32 %s1204_s5, 7  ;;  %p1698_p8 = pneg %p1697_p0 }
 0x6ce   : > { %s1206_s16 = scalar_lea.hbm %s2373_s19, %s1366_s25  ;;  %p1703_p10 = scmp.lt.s32.totalorder %s1701_s29, %s1695_s13 }
 0x6d0   : > { %p1704_p1 = por %p1703_p10, %p1702_p5 }
 0x6d2   : > { %p1705_p3 = pnand %p1704_p1, %p1698_p8 }
 0x6d4   : > { %1708 = shalt.err (!%p1705_p3)
}
 0x6d5   : > { %s1709_s10 = scalar_lea.hbm %s1206_s16, 128  ;;  %s1713_s15 = scalar_lea.hbm %s2373_s19, 256 }
 0x6d6   : > { %p1710_p6 = scmp.ne.s32.totalorder %s1206_s16, %s1709_s10  ;;  %p1714_p2 = scmp.lt.u32.totalorder %s1206_s16, %s2373_s19 }
 0x6d7   : > { %p1715_p9 = scmp.lt.u32.totalorder %s1713_s15, %s1709_s10  ;;  %p1717_p13 = scmp.lt.u32.totalorder %s1709_s10, %s1206_s16 }
 0x6d8   : > { %p1711_p11 = pnand %p1710_p6, %p2374_p7 }
 0x6d9   : > { %p1716_p12 = por %p1715_p9, %p1714_p2 }
 0x6da   : > { %p1712_p4 = pneg %p1711_p11 }
 0x6db   : > { %p1718_p0 = por %p1717_p13, %p1716_p12 }
 0x6dd   : > { %p1719_p8 = pnand %p1718_p0, %p1712_p4 }
 0x6df   : > { %1722 = shalt.err (!%p1719_p8)
}
 0x6e0   : > { %1501 = dma.vmem_to_hbm [thread:$0]  (%p2374_p7), %s2272_s18, 128, %s1206_s16, %s1193_s7  }
 0x6e1 PF: > { %s1220_s25 = sand.u32 1, %s1785_s22   ;;  %p2375_p5 = scmp.ne.s32.totalorder %s2361_s27, 0 }
 0x6e2   : > { %p2376_p10 = scmp.ge.s32.totalorder %s1829_s6, 2  ;;  %s1221_s24 = scalar_lea.sflag [#allocation8], %s1220_s25 }
 0x6e4   : > { %p1511_p1 = pnand %p2376_p10, %p2375_p5 }
 0x6e6   : > { %1780 = dma.done.wait (!%p1511_p1), %s1221_s24, 128  }
 0x6e7   : > { %1782 = vsyncadd (!%p1511_p1), %s1221_s24, 4294967168  ;;  %s26_s6 = sadd.s32 1, %s1829_s6   ;;  %s2377_s12 = sld [smem:[#allocation15_spill]] }
 0x6e8   : > { %p23_p3 = scmp.ge.s32.totalorder %s26_s6, 4   ;;  %s2378_s24 = sld [smem:[#allocation18_spill]] }
 0x6e9   : > { %s2379_s21 = sld [smem:[#allocation17_spill]]  ;;  %s2380_s18 = sld [smem:[#allocation16_spill]] }
 0x6ea   : > { %s2381_s22 = smov %s1789_s23  ;;  %s2383_s25 = smov %s1801_s26 }
 0x6eb   : > { %s2384_s26 = smov %s1805_s0  ;;  %s2385_s0 = smov %s2060_s20 }
 0x6ec   : > { %s2386_s27 = smov %s1813_s1  ;;  %s2387_s1 = smov %s1817_s28 }
 0x6ed   : > { %s2382_s23 = smov %s2377_s12  ;;  %s2389_s29 = smov %s1825_s30 }
 0x6ee   :  { %25 = sbr.rel (!%p23_p3) target bundleno = 15 (0xf), region = 105 }
 0x6ef   : > { %s2388_s28 = smov %s2379_s21  ;;  %s2390_s30 = smov %s2380_s18 }
 0x6f5   :  { %1226 = vsyncpa [#allocation7], 1 }
 0x6f6   :  { %1228 = vsyncpa [#allocation7 + $0x1], 1 }
 0x6f7   :  { %1229 = vsyncpa [#allocation10], 1 }
 0x6f8   :  { %1231 = vsyncpa [#allocation10 + $0x1], 1 }
 0x6f9   :  { %1232 = vsyncpa [#allocation8], 1 }
 0x6fa   :  { %1234 = vsyncpa [#allocation8 + $0x1], 1 }

</bundles_post_ra>
